<compile_context>
chip_gen: v7x
topology: tpu7x:2x2x1
jax: 0.10.0
libtpu: 0.0.40
codegen_flags: <defaults>
</compile_context>

<pallas_src>
import jax
import jax.numpy as jnp
from jax.experimental import pallas as pl
from jax.experimental.pallas import tpu as pltpu

BN_EPS = 1e-5                 # torch.nn.BatchNorm default eps
_TARGET_TILE_P = 65536        # lanes per pixel tile (multiple of 128)
_STATS_CHUNKS = 4             # parallel partial-stat chunks (megacore + conditioning)
_VMEM_LIMIT = 48 * 1024 * 1024


def _pick_tile_p(hw):
    """Lane-dense pixel tile: multiple of 128 (or full extent when hw < 128)."""
    if hw < 128:
        return hw
    return min(_TARGET_TILE_P, (hw // 128) * 128)


def _make_stats_kernel(tile_p, hw, tiles_per_chunk, full_tiles, needs_tail_mask):
    """Pass 1: accumulate per-channel sum / sum-sq of z = W1 @ x over pixels."""

    def kernel(x_ref, w1_ref, stats_ref):
        # x_ref:     (C, tile_p)   one image's pixel tile (N, chunk dims squeezed)
        # w1_ref:    (9, C) bf16   conv1 1x1 weight
        # stats_ref: (2, 9)        [sum(z); sum(z^2)] -- resident across tile axis
        c = pl.program_id(1)
        t = pl.program_id(2)
        t_global = c * tiles_per_chunk + t

        @pl.when(t == 0)
        def _init():
            stats_ref[...] = jnp.zeros_like(stats_ref)

        # bf16 x bf16 -> f32 accumulate: single-pass MXU.
        z = jnp.dot(w1_ref[...], x_ref[...].astype(jnp.bfloat16),
                    preferred_element_type=jnp.float32)      # (9, tile_p) f32

        def accumulate(zv):
            stats_ref[0:1, :] += jnp.sum(zv, axis=1)[None, :]
            stats_ref[1:2, :] += jnp.sum(zv * zv, axis=1)[None, :]

        if needs_tail_mask:
            # Bulk tiles: fully in range, no mask work.
            @pl.when(t_global < full_tiles)
            def _bulk():
                accumulate(z)

            # Tail (partial or fully-out-of-range padded grid step): mask AFTER
            # the dot -- clipped input blocks carry unspecified padding lanes.
            @pl.when(t_global >= full_tiles)
            def _tail():
                lane = jax.lax.broadcasted_iota(jnp.int32, z.shape, 1)
                zm = jnp.where(t_global * tile_p + lane < hw, z, 0.0)
                accumulate(zm)
        else:
            accumulate(z)

    return kernel


def _make_apply_kernel(c_in):
    """Pass 2: folded conv1+BN -> ReLU -> conv2 on one pixel tile."""

    def kernel(x_ref, p_ref, o_ref):
        # x_ref: (C, tile_p)
        # p_ref: (12, K) packed params:
        #          rows 0:9,  cols 0:C    -> W1' (BN folded)
        #          rows 0:9,  col  C      -> b1'
        #          rows 9:12, cols 0:9    -> W2
        #          rows 9:12, col  9      -> b2
        # o_ref: (3, tile_p)
        w1f = p_ref[0:9, 0:c_in].astype(jnp.bfloat16)   # (9, C)
        b1f = p_ref[0:9, c_in:c_in + 1]                 # (9, 1) f32
        w2 = p_ref[9:12, 0:9].astype(jnp.bfloat16)      # (3, 9)
        b2 = p_ref[9:12, 9:10]                          # (3, 1) f32

        xb = x_ref[...].astype(jnp.bfloat16)
        y = jnp.dot(w1f, xb, preferred_element_type=jnp.float32) + b1f
        y = jnp.maximum(y, 0.0)                          # ReLU
        o = jnp.dot(w2, y.astype(jnp.bfloat16),
                    preferred_element_type=jnp.float32) + b2
        # TODO(synk): output (and x stream) kept f32 to match the PyTorch module
        # exactly; bf16 I/O would cut HBM traffic further if the backbone allows.
        o_ref[...] = o.astype(o_ref.dtype)

    return kernel


def ismodel_forward(x_nchw, params, *, tile_p_override=None):
    """Forward of ISModel.input_block in Pallas; backbone treated as identity."""
    w1, b1, gamma, beta, w2, b2 = params
    N, C, H, W = x_nchw.shape
    HW = H * W

    tile_p = tile_p_override if tile_p_override is not None else _pick_tile_p(HW)
    num_tiles = pl.cdiv(HW, tile_p)
    full_tiles = HW // tile_p
    n_chunks = max(1, min(_STATS_CHUNKS, num_tiles))
    tiles_per_chunk = pl.cdiv(num_tiles, n_chunks)
    total_tiles = n_chunks * tiles_per_chunk
    needs_tail_mask = (HW % tile_p != 0) or (total_tiles != num_tiles)
    last_tile = num_tiles - 1

    # Free, contiguous reshape -- stays in NCHW order in HBM (no transpose).
    x3 = x_nchw.reshape(N, C, HW)
    w1_bf = w1.astype(jnp.bfloat16)

    # ---------------- pass 1: streamed BN batch statistics ----------------
    stats = pl.pallas_call(
        _make_stats_kernel(tile_p, HW, tiles_per_chunk, full_tiles, needs_tail_mask),
        out_shape=jax.ShapeDtypeStruct((N, n_chunks, 2, 9), jnp.float32),
        grid=(N, n_chunks, tiles_per_chunk),
        in_specs=[
            pl.BlockSpec(
                (None, C, tile_p),
                # Padded grid steps (when chunks don't divide num_tiles) clamp to
                # the last valid tile; their contribution is fully masked out.
                lambda n, c, t: (n, 0,
                                 jnp.minimum(c * tiles_per_chunk + t, last_tile))),
            pl.BlockSpec((9, C), lambda n, c, t: (0, 0)),
        ],
        out_specs=pl.BlockSpec((None, None, 2, 9), lambda n, c, t: (n, c, 0, 0)),
        compiler_params=pltpu.CompilerParams(
            dimension_semantics=("parallel", "parallel", "arbitrary"),
            vmem_limit_bytes=_VMEM_LIMIT),
    )(x3, w1_bf)

    # -------- tiny XLA glue: finalize stats, fold BN into conv1 --------
    # Training-mode BatchNorm: batch statistics over all N*H*W pixels, biased
    # variance (matches torch BN forward normalization during training).
    # TODO(synk): eval-mode BN (running_mean/running_var) not implemented here.
    count = jnp.float32(N * HW)
    total = jnp.sum(stats, axis=(0, 1))            # (2, 9) across images & chunks
    mean_z = total[0] / count                      # mean of W1 @ x
    ez2 = total[1] / count
    mean_y = mean_z + b1                           # mean of conv1 output
    var_y = jnp.maximum(ez2 - mean_z * mean_z, 0.0)  # biased var(conv1 out)
    scale = gamma * jax.lax.rsqrt(var_y + BN_EPS)  # (9,)
    w1_folded = w1 * scale[:, None]                # (9, C)
    b1_folded = (b1 - mean_y) * scale + beta       # (9,)

    # Pack all pass-2 params into one small block (single DMA, resident in VMEM).
    K = max(C + 1, 10)
    p2 = jnp.zeros((12, K), jnp.float32)
    p2 = p2.at[0:9, 0:C].set(w1_folded)
    p2 = p2.at[0:9, C].set(b1_folded)
    p2 = p2.at[9:12, 0:9].set(w2)
    p2 = p2.at[9:12, 9].set(b2)

    # ------------- pass 2: streamed folded conv/BN -> ReLU -> conv -------------
    out3 = pl.pallas_call(
        _make_apply_kernel(C),
        out_shape=jax.ShapeDtypeStruct((N, 3, HW), jnp.float32),
        grid=(N, num_tiles),
        in_specs=[
            pl.BlockSpec((None, C, tile_p), lambda n, t: (n, 0, t)),
            pl.BlockSpec((12, K), lambda n, t: (0, 0)),
        ],
        out_specs=pl.BlockSpec((None, 3, tile_p), lambda n, t: (n, 0, t)),
        compiler_params=pltpu.CompilerParams(
            dimension_semantics=("parallel", "parallel"),
            vmem_limit_bytes=_VMEM_LIMIT),
    )(x3, p2)

    out = out3.reshape(N, 3, H, W)   # free reshape back to NCHW

    # TODO(synk): backbone is an arbitrary user-supplied nn.Module with no
    # defined architecture here; treated as identity.
    return out


def make_params(key, in_channels=3):
    """Deterministic synthetic parameters matching the module's __init__ shapes."""
    c_in = in_channels + 3  # conv1 input channels
    k1, k2, k3, k4 = jax.random.split(key, 4)
    # conv1: weight (9, c_in, 1, 1) -> squeezed (9, c_in); bias (9,)
    w1 = jax.random.normal(k1, (9, c_in), jnp.float32) * 0.1
    b1 = jax.random.normal(k2, (9,), jnp.float32) * 0.05
    # BatchNorm(9): gamma ones, beta zeros (torch default init)
    gamma = jnp.ones((9,), jnp.float32)
    beta = jnp.zeros((9,), jnp.float32)
    # conv2: weight (3, 9, 1, 1) -> (3, 9); bias (3,)
    w2 = jax.random.normal(k3, (3, 9), jnp.float32) * 0.1
    b2 = jax.random.normal(k4, (3,), jnp.float32) * 0.05
    return (w1, b1, gamma, beta, w2, b2)


def _reference(x, params):
    """Pure-JAX reference of the input_block (training-mode BN)."""
    w1, b1, gamma, beta, w2, b2 = params
    hi = jax.lax.Precision.HIGHEST
    y = jnp.einsum("oc,nchw->nohw", w1, x, precision=hi) + b1[None, :, None, None]
    mean = jnp.mean(y, axis=(0, 2, 3), keepdims=True)
    var = jnp.mean((y - mean) ** 2, axis=(0, 2, 3), keepdims=True)
    y = (y - mean) * jax.lax.rsqrt(var + BN_EPS)
    y = y * gamma[None, :, None, None] + beta[None, :, None, None]
    y = jnp.maximum(y, 0.0)
    o = jnp.einsum("oc,nchw->nohw", w2, y, precision=hi) + b2[None, :, None, None]
    return o


if __name__ == "__main__":
    key = jax.random.PRNGKey(0)
    kx, kp, kx2 = jax.random.split(key, 3)

    in_channels = 3
    N, H, W = 2, 16, 16
    C = in_channels + 3  # image channels + 3 interaction/click channels
    x = jax.random.normal(kx, (N, C, H, W), jnp.float32)

    params = make_params(kp, in_channels=in_channels)

    out = jax.jit(ismodel_forward)(x, params)
    out = jax.block_until_ready(out)

    assert out.shape == (N, 3, H, W), out.shape
    assert out.dtype == jnp.float32
    assert bool(jnp.all(jnp.isfinite(out)))

    ref = _reference(x, params)
    assert bool(jnp.allclose(out, ref, atol=2e-2, rtol=2e-2)), (
        float(jnp.max(jnp.abs(out - ref))))

    # Second check: exercises multi-tile streaming, ragged tail-tile masking and
    # chunked partial statistics (forced small tile; HW=400 = 3*128 + 16).
    x2 = jax.random.normal(kx2, (1, C, 20, 20), jnp.float32)
    out2 = jax.block_until_ready(ismodel_forward(x2, params, tile_p_override=128))
    ref2 = _reference(x2, params)
    assert out2.shape == (1, 3, 20, 20)
    assert bool(jnp.all(jnp.isfinite(out2)))
    assert bool(jnp.allclose(out2, ref2, atol=2e-2, rtol=2e-2)), (
        float(jnp.max(jnp.abs(out2 - ref2))))

    print("KERNEL_OK")
</pallas_src>

<mosaic_0001>
module attributes {stable_mosaic.version = 11 : i64} {
  func.func @kernel(%arg0: i32, %arg1: i32, %arg2: i32, %arg3: memref<1x6x256xf32, #tpu.memory_space<vmem>>, %arg4: memref<9x6xbf16, #tpu.memory_space<vmem>>, %arg5: memref<1x1x2x9xf32, #tpu.memory_space<vmem>>) attributes {dimension_semantics = [#tpu.dimension_semantics<parallel>, #tpu.dimension_semantics<parallel>, #tpu.dimension_semantics<arbitrary>], iteration_bounds = array<i64: 2, 1, 1>, scalar_prefetch = 0 : i64, scratch_operands = 0 : i64, tpu.core_type = #tpu.core_type<tc>, window_params = [{transform_indices = @transform_0, window_bounds = array<i64: 1, 6, 256>}, {pipeline_mode = #tpu.pipeline_mode<synchronous>, transform_indices = @transform_1, window_bounds = array<i64: 9, 6>}, {transform_indices = @transform_2, window_bounds = array<i64: 1, 1, 2, 9>}]} {
    %c0_i32 = arith.constant 0 : i32
    %0 = arith.cmpi eq, %arg2, %c0_i32 : i32
    %1 = arith.extui %0 : i1 to i32
    %c0_i32_0 = arith.constant 0 : i32
    %2 = arith.cmpi ne, %1, %c0_i32_0 : i32
    scf.if %2 {
      %cst_22 = arith.constant 0.000000e+00 : f32
      %25 = vector.broadcast %cst_22 : f32 to vector<2x9xf32>
      %c0_23 = arith.constant 0 : index
      %c0_24 = arith.constant 0 : index
      %c0_25 = arith.constant 0 : index
      %c0_26 = arith.constant 0 : index
      %26 = vector.load %arg5[%c0_23, %c0_24, %c0_25, %c0_26] : memref<1x1x2x9xf32, #tpu.memory_space<vmem>>, vector<1x1x2x9xf32>
      %27 = vector.shape_cast %26 : vector<1x1x2x9xf32> to vector<2x9xf32>
      %28 = vector.shape_cast %25 : vector<2x9xf32> to vector<1x1x2x9xf32>
      tpu.vector_store %arg5[%c0_23, %c0_24, %c0_25, %c0_26], %28 {strides = array<i32>} : memref<1x1x2x9xf32, #tpu.memory_space<vmem>>, vector<1x1x2x9xf32>,
    } else {
    }
    %c0 = arith.constant 0 : index
    %c0_1 = arith.constant 0 : index
    %3 = vector.load %arg4[%c0, %c0_1] : memref<9x6xbf16, #tpu.memory_space<vmem>>, vector<9x6xbf16>
    %c0_2 = arith.constant 0 : index
    %c0_3 = arith.constant 0 : index
    %c0_4 = arith.constant 0 : index
    %4 = vector.load %arg3[%c0_2, %c0_3, %c0_4] : memref<1x6x256xf32, #tpu.memory_space<vmem>>, vector<1x6x256xf32>
    %5 = vector.shape_cast %4 : vector<1x6x256xf32> to vector<6x256xf32>
    %6 = arith.truncf %5 : vector<6x256xf32> to vector<6x256xbf16>
    %cst = arith.constant dense<0.000000e+00> : vector<9x256xf32>
    %7 = tpu.matmul %3, %6, %cst {dimension_numbers = #tpu.dot_dimension_numbers<[1], [0], [0], [1], [0, 0, 1, 1], [], []>} : vector<9x6xbf16>, vector<6x256xbf16>, vector<9x256xf32> -> vector<9x256xf32>
    %c0_5 = arith.constant 0 : index
    %c0_6 = arith.constant 0 : index
    %c0_7 = arith.constant 0 : index
    %c0_8 = arith.constant 0 : index
    %8 = vector.load %arg5[%c0_5, %c0_6, %c0_7, %c0_8] : memref<1x1x2x9xf32, #tpu.memory_space<vmem>>, vector<1x1x1x9xf32>
    %9 = vector.shape_cast %8 : vector<1x1x1x9xf32> to vector<1x9xf32>
    %cst_9 = arith.constant dense<0.000000e+00> : vector<9xf32>
    %10 = vector.multi_reduction <add>, %7, %cst_9 [1] : vector<9x256xf32> to vector<9xf32>
    %11 = vector.shape_cast %10 : vector<9xf32> to vector<1x9xf32>
    %12 = arith.addf %9, %11 : vector<1x9xf32>
    %c0_10 = arith.constant 0 : index
    %c0_11 = arith.constant 0 : index
    %c0_12 = arith.constant 0 : index
    %c0_13 = arith.constant 0 : index
    %13 = vector.load %arg5[%c0_10, %c0_11, %c0_12, %c0_13] : memref<1x1x2x9xf32, #tpu.memory_space<vmem>>, vector<1x1x1x9xf32>
    %14 = vector.shape_cast %13 : vector<1x1x1x9xf32> to vector<1x9xf32>
    %15 = vector.shape_cast %12 : vector<1x9xf32> to vector<1x1x1x9xf32>
    tpu.vector_store %arg5[%c0_10, %c0_11, %c0_12, %c0_13], %15 {strides = array<i32>} : memref<1x1x2x9xf32, #tpu.memory_space<vmem>>, vector<1x1x1x9xf32>,
    %c0_14 = arith.constant 0 : index
    %c0_15 = arith.constant 0 : index
    %c1 = arith.constant 1 : index
    %c0_16 = arith.constant 0 : index
    %16 = vector.load %arg5[%c0_14, %c0_15, %c1, %c0_16] : memref<1x1x2x9xf32, #tpu.memory_space<vmem>>, vector<1x1x1x9xf32>
    %17 = vector.shape_cast %16 : vector<1x1x1x9xf32> to vector<1x9xf32>
    %18 = arith.mulf %7, %7 : vector<9x256xf32>
    %cst_17 = arith.constant dense<0.000000e+00> : vector<9xf32>
    %19 = vector.multi_reduction <add>, %18, %cst_17 [1] : vector<9x256xf32> to vector<9xf32>
    %20 = vector.shape_cast %19 : vector<9xf32> to vector<1x9xf32>
    %21 = arith.addf %17, %20 : vector<1x9xf32>
    %c0_18 = arith.constant 0 : index
    %c0_19 = arith.constant 0 : index
    %c1_20 = arith.constant 1 : index
    %c0_21 = arith.constant 0 : index
    %22 = vector.load %arg5[%c0_18, %c0_19, %c1_20, %c0_21] : memref<1x1x2x9xf32, #tpu.memory_space<vmem>>, vector<1x1x1x9xf32>
    %23 = vector.shape_cast %22 : vector<1x1x1x9xf32> to vector<1x9xf32>
    %24 = vector.shape_cast %21 : vector<1x9xf32> to vector<1x1x1x9xf32>
    tpu.vector_store %arg5[%c0_18, %c0_19, %c1_20, %c0_21], %24 {strides = array<i32>} : memref<1x1x2x9xf32, #tpu.memory_space<vmem>>, vector<1x1x1x9xf32>,
    return
  }
  func.func @transform_0(%arg0: i32, %arg1: i32, %arg2: i32) -> (i32, i32, i32) {
    %c1_i32 = arith.constant 1 : i32
    %0 = arith.muli %arg1, %c1_i32 : i32
    %1 = arith.addi %0, %arg2 : i32
    %c0_i32 = arith.constant 0 : i32
    %2 = arith.minsi %1, %c0_i32 : i32
    %c0_i32_0 = arith.constant 0 : i32
    %c0_i32_1 = arith.constant 0 : i32
    return %arg0, %c0_i32_0, %2 : i32, i32, i32
  }
  func.func @transform_1(%arg0: i32, %arg1: i32, %arg2: i32) -> (i32, i32) {
    %c0_i32 = arith.constant 0 : i32
    %c0_i32_0 = arith.constant 0 : i32
    %c0_i32_1 = arith.constant 0 : i32
    return %c0_i32, %c0_i32_0 : i32, i32
  }
  func.func @transform_2(%arg0: i32, %arg1: i32, %arg2: i32) -> (i32, i32, i32, i32) {
    %c0_i32 = arith.constant 0 : i32
    %c0_i32_0 = arith.constant 0 : i32
    %c0_i32_1 = arith.constant 0 : i32
    return %arg0, %arg1, %c0_i32, %c0_i32_0 : i32, i32, i32, i32
  }
}

module attributes {stable_mosaic.version = 11 : i64} {
  func.func @kernel(%arg0: i32, %arg1: i32, %arg2: memref<1x6x256xf32, #tpu.memory_space<vmem>>, %arg3: memref<12x10xf32, #tpu.memory_space<vmem>>, %arg4: memref<1x3x256xf32, #tpu.memory_space<vmem>>) attributes {dimension_semantics = [#tpu.dimension_semantics<parallel>, #tpu.dimension_semantics<parallel>], iteration_bounds = array<i64: 2, 1>, scalar_prefetch = 0 : i64, scratch_operands = 0 : i64, tpu.core_type = #tpu.core_type<tc>, window_params = [{transform_indices = @transform_0, window_bounds = array<i64: 1, 6, 256>}, {pipeline_mode = #tpu.pipeline_mode<synchronous>, transform_indices = @transform_1, window_bounds = array<i64: 12, 10>}, {transform_indices = @transform_2, window_bounds = array<i64: 1, 3, 256>}]} {
    %c0 = arith.constant 0 : index
    %c0_0 = arith.constant 0 : index
    %0 = vector.load %arg3[%c0, %c0_0] : memref<12x10xf32, #tpu.memory_space<vmem>>, vector<9x6xf32>
    %1 = arith.truncf %0 : vector<9x6xf32> to vector<9x6xbf16>
    %c0_1 = arith.constant 0 : index
    %c6 = arith.constant 6 : index
    %2 = vector.load %arg3[%c0_1, %c6] : memref<12x10xf32, #tpu.memory_space<vmem>>, vector<9x1xf32>
    %c9 = arith.constant 9 : index
    %c0_2 = arith.constant 0 : index
    %3 = vector.load %arg3[%c9, %c0_2] : memref<12x10xf32, #tpu.memory_space<vmem>>, vector<3x9xf32>
    %4 = arith.truncf %3 : vector<3x9xf32> to vector<3x9xbf16>
    %c9_3 = arith.constant 9 : index
    %c9_4 = arith.constant 9 : index
    %5 = vector.load %arg3[%c9_3, %c9_4] : memref<12x10xf32, #tpu.memory_space<vmem>>, vector<3x1xf32>
    %c0_5 = arith.constant 0 : index
    %c0_6 = arith.constant 0 : index
    %c0_7 = arith.constant 0 : index
    %6 = vector.load %arg2[%c0_5, %c0_6, %c0_7] : memref<1x6x256xf32, #tpu.memory_space<vmem>>, vector<1x6x256xf32>
    %7 = vector.shape_cast %6 : vector<1x6x256xf32> to vector<6x256xf32>
    %8 = arith.truncf %7 : vector<6x256xf32> to vector<6x256xbf16>
    %cst = arith.constant dense<0.000000e+00> : vector<9x256xf32>
    %9 = tpu.matmul %1, %8, %cst {dimension_numbers = #tpu.dot_dimension_numbers<[1], [0], [0], [1], [0, 0, 1, 1], [], []>} : vector<9x6xbf16>, vector<6x256xbf16>, vector<9x256xf32> -> vector<9x256xf32>
    %10 = vector.broadcast %2 : vector<9x1xf32> to vector<9x256xf32>
    %11 = arith.addf %9, %10 : vector<9x256xf32>
    %cst_8 = arith.constant 0.000000e+00 : f32
    %12 = vector.broadcast %cst_8 : f32 to vector<9x256xf32>
    %13 = arith.maximumf %11, %12 : vector<9x256xf32>
    %14 = arith.truncf %13 : vector<9x256xf32> to vector<9x256xbf16>
    %cst_9 = arith.constant dense<0.000000e+00> : vector<3x256xf32>
    %15 = tpu.matmul %4, %14, %cst_9 {dimension_numbers = #tpu.dot_dimension_numbers<[1], [0], [0], [1], [0, 0, 1, 1], [], []>} : vector<3x9xbf16>, vector<9x256xbf16>, vector<3x256xf32> -> vector<3x256xf32>
    %16 = vector.broadcast %5 : vector<3x1xf32> to vector<3x256xf32>
    %17 = arith.addf %15, %16 : vector<3x256xf32>
    %c0_10 = arith.constant 0 : index
    %c0_11 = arith.constant 0 : index
    %c0_12 = arith.constant 0 : index
    %18 = vector.load %arg4[%c0_10, %c0_11, %c0_12] : memref<1x3x256xf32, #tpu.memory_space<vmem>>, vector<1x3x256xf32>
    %19 = vector.shape_cast %18 : vector<1x3x256xf32> to vector<3x256xf32>
    %20 = vector.shape_cast %17 : vector<3x256xf32> to vector<1x3x256xf32>
    tpu.vector_store %arg4[%c0_10, %c0_11, %c0_12], %20 {strides = array<i32>} : memref<1x3x256xf32, #tpu.memory_space<vmem>>, vector<1x3x256xf32>,
    return
  }
  func.func @transform_0(%arg0: i32, %arg1: i32) -> (i32, i32, i32) {
    %c0_i32 = arith.constant 0 : i32
    %c0_i32_0 = arith.constant 0 : i32
    return %arg0, %c0_i32, %arg1 : i32, i32, i32
  }
  func.func @transform_1(%arg0: i32, %arg1: i32) -> (i32, i32) {
    %c0_i32 = arith.constant 0 : i32
    %c0_i32_0 = arith.constant 0 : i32
    %c0_i32_1 = arith.constant 0 : i32
    return %c0_i32, %c0_i32_0 : i32, i32
  }
  func.func @transform_2(%arg0: i32, %arg1: i32) -> (i32, i32, i32) {
    %c0_i32 = arith.constant 0 : i32
    %c0_i32_0 = arith.constant 0 : i32
    return %arg0, %c0_i32, %arg1 : i32, i32, i32
  }
}

</mosaic_0001>

<bundles_post_ra>
// kernel: ismodel_forward.2
= control target key start
LH: loop header
LB: loop body
LE: loop exit
PB: predicated region body
PF: predicated region fallthrough
CT: control target
= control target key end

     0   :  { %s496_s9 = smov 0   ;;  %s498_s10 = smov 0   ;;  %s543_s0 = inlined_call_operand.vmem [shape: f32[2,6,256], index: 0, kind: input, shape index: {}]   ;;  %s544_s1 = inlined_call_operand.vmem [shape: bf16[9,6], index: 1, kind: input, shape index: {}]   ;;  %s545_s2 = inlined_call_operand.vmem [shape: f32[2,1,2,9], index: 2, kind: output, shape index: {}]  }
   0x1   :  { %s500_s11 = smov 0  }
   0x2 LB: > { %s31_s12 = sadd.s32 1, %s473_s10  ;;  %p418_p0 = scmp.ge.s32.totalorder %s477_s11, 1  ;;  %s477_s11 = sphi %s500_s11, %s12_s11   ;;  %s473_s10 = sphi %s498_s10, %s547_s10   ;;  %s469_s9 = sphi %s496_s9, %s546_s9  }
   0x3   : > { %p33_p1 = scmp.ge.s32.totalorder %s31_s12, 2  ;;  %p152_p2 = scmp.lt.s32.totalorder %s477_s11, 3 }
   0x5   : > { %s549_s12 = smov (%p33_p1, %s31_s12), 0  ;;  %p153_p3 = pnand %p418_p0, %p152_p2 }
   0x6   : > { %p187_p4 = scmp.lt.s32.totalorder (!%p153_p3), %s469_s9, 1  ;;  %v479_v0 = vmov (!%p153_p3), 0   ;;  %vm211_vm0 = vcmask (!%p153_p3), 66560   ;;  %v480_v1 = vmov (!%p153_p3), 0.0   ;;  %vm228_vm1 = vcmask (!%p153_p3), 1042432  }
   0x7   : > { %156 = sbr.rel (%p153_p3) target bundleno = 393 (0x189), region = 28  ;;  %267 = vmatprep.mubr.bf16.mxu0 (!%p153_p3), %v479_v0  ;;  %v454_v7 = vld [vmem:[%s544_s1] sm:$0x1f] (!%p153_p3)   ;;  %vm224_vm2 = vcmask (!%p153_p3), 48128   ;;  %vm282_vm3 = vcmask (!%p153_p3), 1040384   ;;  %v290_v24 = vlaneseq (!%p153_p3)  ;;  %vm301_vm4 = vcmask (!%p153_p3), 130112  }
   0x8   : > { %vm305_vm5 = vcmask (!%p153_p3), 65536  }
   0x9   : > { %v291_v25 = vand.u32 (!%p153_p3), 127, %v290_v24  ;;  %v293_v26 = vshrl.u32 (!%p153_p3), %v290_v24, 7 }
   0xb   : > { %v296_v27 = vadd.s32 (!%p153_p3), 4294967288, %v291_v25  ;;  %v294_v29 = vsub.s32 (!%p153_p3), %v291_v25, %v293_v26 }
   0xd   : > { %v299_v30 = vsub.s32 (!%p153_p3), %v296_v27, %v293_v26 }
   0xe   : > { %s551_s9 = smov (!%p187_p4, %s469_s9), 1 }
   0xf   : > { %s427_s13 = sshll.u32 %s551_s9, 4  ;;  %s421_s14 = sshll.u32 %s551_s9, 1 }
  0x10   : > { %s194_s17 = scalar_lea.vmem %s543_s0, %s427_s13  ;;  %s520_s20 = scalar_lea.vmem %s545_s2, %s421_s14 }
  0x11   : > { %212 = vst.msk [vmem:[%s520_s20] sm:$0x3] %vm211_vm0, %v480_v1  ;;  %v216_v2 = vld [vmem:[%s194_s17 + $0x8] sm:$0x3f]  ;;  %v215_v3 = vld [vmem:[%s194_s17] sm:$0x3f] }
  0x12   : > { %v218_v4 = vpack.c.bf16 %v216_v2, %v216_v2  ;;  %v217_v5 = vpack.c.bf16 %v215_v3, %v215_v3 }
  0x14   : > { %423 = vmatprep.subr.msk.bf16.mxu0 %vm228_vm1, %v218_v4  ;;  %v230_v6 = vsel %vm228_vm1, %v217_v5, 0 }
  0x15   : > { %236 = vmatpush1.bf16.msra.mxu0 %v230_v6 }
  0x18   : > { %424 = vmatmul.mubr.msk.bf16.vlgmr.msra.gmra.mrb[0].mxu0 %vm224_vm2, %v454_v7  ;;  %v278_v34 = vld [vmem:[%s520_s20] sm:$0x1]  ;;  %v307_v39 = vld [vmem:[%s520_s20 + $0x1] sm:$0x1] }
  0xeb   : > { %v269_v8 = vpop.f32.mrb[0].mxu0 }
  0xec   : > { %v308_v9 = vmul.f32 %v269_v8, %v269_v8  ;;  %v271_v10 = vpop.f32.mrb[1].mxu0 }
  0xed   : > { %v309_v11 = vmul.f32 %v271_v10, %v271_v10  ;;  %v273_v12 = vpop.f32.mrb[2].mxu0  ;;  %v279_v13 = vadd.f32 %v271_v10, %v269_v8 }
  0xee   : > { %v283_v14 = vsel %vm282_vm3, %v273_v12, 0.0  ;;  %v310_v15 = vmul.f32 %v273_v12, %v273_v12  ;;  %v275_v16 = vpop.f32.mrb[3].mxu0 }
  0xef   : > { %v284_v17 = vsel %vm282_vm3, %v275_v16, 0.0  ;;  %v311_v18 = vmul.f32 %v275_v16, %v275_v16  ;;  %280 = vadd.xlane.f32.xlu0 %v279_v13  ;;  %v312_v19 = vadd.f32 %v309_v11, %v308_v9 }
  0xf0   : > { %v285_v20 = vadd.f32 %v284_v17, %v283_v14  ;;  %v315_v21 = vsel %vm282_vm3, %v310_v15, 0.0 }
  0xf1   : > { %313 = vadd.xlane.f32.xlu1 %v312_v19  ;;  %v316_v22 = vsel %vm282_vm3, %v311_v18, 0.0 }
  0xf2   : > { %v317_v23 = vadd.f32 %v316_v22, %v315_v21 }
  0xf3   : > { %286 = vadd.xlane.f32.xlu0 %v285_v20 }
  0xf5   : > { %318 = vadd.xlane.f32.xlu1 %v317_v23 }
 0x17c   : > { %v281_v28 = vpop.xlane.xlu0 %280 }
 0x17d   : > { %v295_v33 = vrot.slane %v281_v28, %v294_v29 }
 0x17e   : > { %v314_v31 = vpop.xlane.xlu1 %313 }
 0x17f   : > { %v325_v37 = vrot.slane %v314_v31, %v294_v29 }
 0x180   : > { %v287_v32 = vpop.xlane.xlu0 %286 }
 0x181   : > { %v300_v35 = vrot.slane %v287_v32, %v299_v30 }
 0x182   : > { %v319_v36 = vpop.xlane.xlu1 %318 }
 0x183   : > { %v302_v38 = vsel %vm301_vm4, %v300_v35, %v295_v33  ;;  %v329_v40 = vrot.slane %v319_v36, %v299_v30 }
 0x184   : > { %v304_v41 = vadd.f32 %v302_v38, %v278_v34 }
 0x185   : > { %v330_v42 = vsel %vm301_vm4, %v329_v40, %v325_v37 }
 0x186   : > { %306 = vst.msk [vmem:[%s520_s20] sm:$0x1] %vm305_vm5, %v304_v41  ;;  %v332_v43 = vadd.f32 %v330_v42, %v307_v39 }
 0x188   : > { %333 = vst.msk [vmem:[%s520_s20 + $0x1] sm:$0x1] %vm305_vm5, %v332_v43 }
 0x189 PF: > { %s12_s11 = sadd.s32 1, %s477_s11   ;;  %s546_s9 = smov %s473_s10 }
 0x18a   : > { %p9_p5 = scmp.ge.s32.totalorder %s12_s11, 4   ;;  %s547_s10 = smov %s549_s12 }
 0x18c   :  { %11 = sbr.rel (!%p9_p5) target bundleno = 2 (0x2), region = 62 }

// kernel: ismodel_forward.3
= control target key start
LH: loop header
LB: loop body
LE: loop exit
PB: predicated region body
PF: predicated region fallthrough
CT: control target
= control target key end

     0   :  { %s505_s9 = smov 0   ;;  %s507_s10 = smov 0   ;;  %s551_s0 = inlined_call_operand.vmem [shape: f32[2,6,256], index: 0, kind: input, shape index: {}]   ;;  %s552_s1 = inlined_call_operand.vmem [shape: f32[12,10], index: 1, kind: input, shape index: {}]   ;;  %s553_s2 = inlined_call_operand.vmem [shape: f32[2,3,256], index: 2, kind: output, shape index: {}]  }
   0x1   :  { %s509_s11 = smov 0  }
   0x2 LB: > { %s24_s12 = sadd.s32 1, %s480_s10  ;;  %p419_p0 = scmp.ge.s32.totalorder %s484_s11, 1  ;;  %s484_s11 = sphi %s509_s11, %s12_s11   ;;  %s480_s10 = sphi %s507_s10, %s555_s10   ;;  %s476_s9 = sphi %s505_s9, %s554_s9  }
   0x3   : > { %p26_p1 = scmp.ge.s32.totalorder %s24_s12, 2  ;;  %p133_p2 = scmp.lt.s32.totalorder %s484_s11, 3 }
   0x5   : > { %s557_s12 = smov (%p26_p1, %s24_s12), 0  ;;  %p134_p3 = pnand %p419_p0, %p133_p2 }
   0x6   : > { %p164_p4 = scmp.lt.s32.totalorder (!%p134_p3), %s476_s9, 1  ;;  %v486_v0 = vmov (!%p134_p3), 0   ;;  %v184_v1 = vld [vmem:[%s552_s1] sm:$0xff] (!%p134_p3)  ;;  %v487_v2 = vmov (!%p134_p3), 6   ;;  %vm207_vm0 = vcmask (!%p134_p3), 1042432   ;;  %vm203_vm1 = vcmask (!%p134_p3), 48128  }
   0x7   : > { %137 = sbr.rel (%p134_p3) target bundleno = 469 (0x1d5), region = 28  ;;  %246 = vmatprep.mubr.bf16.mxu0 (!%p134_p3), %v486_v0  ;;  %314 = vmatprep.mubr.bf16.mxu1 (!%p134_p3), %v486_v0  ;;  %v185_v5 = vld [vmem:[%s552_s1 + $0x8] sm:$0x1] (!%p134_p3)  ;;  %v187_v10 = vld [vmem:[%s552_s1 + $0x9] sm:$0x7] (!%p134_p3)  ;;  %v488_v11 = vmov (!%p134_p3), 9  }
   0x8   : > { %459 = vset.pattern.permute.xlu0 (!%p134_p3), %v487_v2  ;;  %v186_v9 = vpack.c.bf16 (!%p134_p3), %v185_v5, %v184_v1  ;;  %460 = vset.pattern.permute.xlu1 (!%p134_p3), %v488_v11  ;;  %vm272_vm2 = vcmask (!%p134_p3), 1043456   ;;  %vm273_vm3 = vcmask (!%p134_p3), 1044480   ;;  %v489_v22 = vmov (!%p134_p3), 65535  }
   0x9   : > { %195 = vperm.xlu0 (!%p134_p3), %459, %v184_v1   ;;  %265 = vperm.xlu1 (!%p134_p3), %460, %v187_v10   ;;  %v274_v23 = vsel (!%p134_p3), %vm272_vm2, 4294967295, %v489_v22  ;;  %v188_v33 = vpack.c.bf16 (!%p134_p3), %v187_v10, %v187_v10  ;;  %vm268_vm4 = vcmask (!%p134_p3), 72704  }
   0xa   : > { %v275_v29 = vsel (!%p134_p3), %vm273_vm3, %v274_v23, 0 }
   0xd   : > { %200 = vperm.xlu0 (!%p134_p3), %459, %v185_v5  }
   0xe   : > { %s559_s9 = smov (!%p164_p4, %s476_s9), 1 }
   0xf   : > { %s429_s15 = sshll.u32 %s559_s9, 4  ;;  %s430_s23 = sshll.u32 %s559_s9, 3 }
  0x10   : > { %s171_s18 = scalar_lea.vmem %s551_s0, %s429_s15  ;;  %s181_s26 = scalar_lea.vmem %s553_s2, %s430_s23 }
  0x11   : > { %v190_v3 = vld [vmem:[%s171_s18 + $0x8] sm:$0x3f]  ;;  %v189_v4 = vld [vmem:[%s171_s18] sm:$0x3f]  ;;  %461 = vset.pattern.permute.xlu0 %v488_v11 }
  0x12   : > { %v192_v6 = vpack.c.bf16 %v190_v3, %v190_v3  ;;  %v191_v7 = vpack.c.bf16 %v189_v4, %v189_v4 }
  0x14   : > { %424 = vmatprep.subr.msk.bf16.mxu0 %vm207_vm0, %v192_v6  ;;  %v209_v8 = vsel %vm207_vm0, %v191_v7, 0 }
  0x15   : > { %215 = vmatpush1.bf16.msra.mxu0 %v209_v8 }
  0x18   : > { %425 = vmatmul.mubr.msk.bf16.vlgmr.msra.gmra.mrb[0].mxu0 %vm203_vm1, %v186_v9 }
  0x88   : > { %v196_v12 = vpop.permute.xlu0 %195  ;;  %v266_v34 = vpop.permute.xlu1 %265 }
  0x8c   : > { %v201_v16 = vpop.permute.xlu0 %200 }
  0xeb   : > { %v248_v13 = vpop.f32.mrb[0].mxu0 }
  0xec   : > { %v249_v14 = vadd.f32 %v248_v13, %v196_v12  ;;  %v250_v15 = vpop.f32.mrb[1].mxu0 }
  0xed   : > { %v251_v17 = vadd.f32 %v250_v15, %v196_v12  ;;  %v252_v18 = vpop.f32.mrb[2].mxu0 }
  0xee   : > { %v253_v19 = vadd.f32 %v252_v18, %v201_v16  ;;  %v254_v20 = vpop.f32.mrb[3].mxu0  ;;  %v257_v24 = vmax.f32 %v249_v14, 0.0 }
  0xef   : > { %v255_v21 = vadd.f32 %v254_v20, %v201_v16  ;;  %v258_v26 = vmax.f32 %v251_v17, 0.0 }
  0xf0   : > { %v259_v25 = vmax.f32 %v253_v19, 0.0 }
  0xf1   : > { %v260_v27 = vmax.f32 %v255_v21, 0.0 }
  0xf2   : > { %v261_v28 = vpack.c.bf16 %v259_v25, %v257_v24 }
  0xf3   : > { %v262_v30 = vpack.c.bf16 %v260_v27, %v258_v26 }
  0xf4   : > { %v277_v32 = vand.u32 %v275_v29, %v261_v28 }
  0xf5   : > { %v280_v31 = vand.u32 %v275_v29, %v262_v30 }
  0xf7   : > { %282 = vmatprep.subr.bf16.mxu1 %v280_v31 }
  0xf8   : > { %283 = vmatpush1.bf16.msra.mxu1 %v277_v32 }
  0xfb   : > { %426 = vmatmul.mubr.msk.bf16.vlgmr.msra.gmra.mrb[0].mxu1 %vm268_vm4, %v188_v33 }
 0x1ce   : > { %v316_v35 = vpop.f32.mrb[0].mxu1 }
 0x1cf   : > { %v317_v36 = vadd.f32 %v316_v35, %v266_v34  ;;  %v318_v37 = vpop.f32.mrb[1].mxu1 }
 0x1d0   : > { %v319_v38 = vadd.f32 %v318_v37, %v266_v34  ;;  %v320_v39 = vpop.f32.mrb[2].mxu1 }
 0x1d1   : > { %v321_v40 = vpop.f32.mrb[3].mxu1 }
 0x1d2   : > { %v325_v41 = vcombine.low %v317_v36, %v319_v38 }
 0x1d4   : > { %327 = vst [vmem:[%s181_s26] sm:$0x77] %v325_v41 }
 0x1d5 PF: > { %s12_s11 = sadd.s32 1, %s484_s11   ;;  %s554_s9 = smov %s480_s10 }
 0x1d6   : > { %p9_p5 = scmp.ge.s32.totalorder %s12_s11, 4   ;;  %s555_s10 = smov %s557_s12 }
 0x1d8   :  { %11 = sbr.rel (!%p9_p5) target bundleno = 2 (0x2), region = 58 }

</bundles_post_ra>
